<compile_context>
chip_gen: v7x
topology: tpu7x:2x2x1
jax: 0.10.0
libtpu: 0.0.40
codegen_flags: <defaults>
</compile_context>

<pallas_src>
import functools

import jax
import jax.numpy as jnp
from jax.experimental import pallas as pl
from jax.experimental.pallas import tpu as pltpu


EMBED_DIM = 32     # embed_dim
N_EMBED = 128      # n_embed (codebook size)
BETA = 0.25        # commitment beta of VectorQuantizer


def _round_up(x, m):
    return ((x + m - 1) // m) * m


def _vq_kernel(zt_ref, esel_ref, egat_ref, zqt_ref, idx_ref, loss_ref, *,
               tm, n_valid, needs_mask, matmul_dtype):
    """One tile of tokens (transposed, lane-dense) vs. the full codebook.

    zt_ref  : (D, tm)        raw token tile, tokens along lanes
    esel_ref: (n_embed, D)   normalized codebook (selection matmul LHS)
    egat_ref: (D, n_embed)   normalized codebook^T (gather matmul LHS, f32)
    zqt_ref : (D, tm)        nearest normalized codewords (transposed)
    idx_ref : (1, tm)        int32 codebook indices
    loss_ref: (1, tm)        per-token partial loss (padding masked)
    """
    n_embed = esel_ref.shape[0]

    z = zt_ref[...].astype(jnp.float32)                        # (D, tm)
    # F.normalize(z, dim=-1): the D-sum is over the sublane axis -> cheap
    # cross-vreg VPU adds + a short sublane reduce (no 128-lane reduce).
    ssq = jnp.sum(z * z, axis=0, keepdims=True)                 # (1, tm)
    z_n = z * jax.lax.rsqrt(jnp.maximum(ssq, 1e-24))            # (D, tm)

    # Unit vectors on both sides: argmin ||z-e||^2 == argmax <z,e>.
    # Transposed cross -> (n_embed, tm): winner search reduces over the
    # sublane/vreg axis on the VPU instead of a 128-wide lane argmax.
    cross = jnp.dot(esel_ref[...], z_n.astype(matmul_dtype),
                    preferred_element_type=jnp.float32)         # (n_embed, tm)

    # Exact argmax with smallest-index tie-break as max + masked-min
    # (two simple sublane reduces, no paired value+index tracking).
    m = jnp.max(cross, axis=0, keepdims=True)                   # (1, tm)
    rows = jax.lax.broadcasted_iota(jnp.int32, cross.shape, 0)  # (n_embed, tm)
    idx = jnp.min(jnp.where(cross >= m, rows, jnp.int32(n_embed)),
                  axis=0, keepdims=True)                        # (1, tm) int32
    idx_ref[...] = idx

    # Gather codewords with a one-hot matmul; output (D, tm) is lane-dense.
    onehot = (rows == idx).astype(jnp.float32)                  # (n_embed, tm)
    z_q = jnp.dot(egat_ref[...], onehot,
                  preferred_element_type=jnp.float32)           # (D, tm)
    zqt_ref[...] = z_q.astype(zqt_ref.dtype)

    # Per-token partial loss; padded tokens masked out.
    diff = z_q - z_n
    part = jnp.sum(diff * diff, axis=0, keepdims=True)          # (1, tm)
    if needs_mask:
        i = pl.program_id(0)
        col = i * tm + jax.lax.broadcasted_iota(jnp.int32, (1, tm), 1)
        part = jnp.where(col < n_valid, part, 0.0)
    loss_ref[...] = part


def base_quantizer_forward(z, embedding, *, beta=BETA, tm=4096,
                           matmul_dtype=jnp.float32):
    """Forward of BaseQuantizer(use_norm=True, straight_through=True).

    z:         (B, S, D) float32 token sequence (embedding dim last)
    embedding: (n_embed, D) float32 codebook
    matmul_dtype: operand dtype of the selection matmul only
                  (jnp.bfloat16 recommended on v6e/v7x; near-ties may flip
                   indices vs the f32 reference, so default stays f32).
    returns (z_q, loss, encoding_indices) with shapes
            (B, S, D), (), (B, S)   [indices are int32]
    """
    B, S, D = z.shape
    N = B * S
    n_embed = embedding.shape[0]

    # Token tile: multiple of 128; keep >= 2 grid steps when N allows so both
    # v7x TensorCores get work under dimension_semantics=("parallel",).
    n128 = _round_up(N, 128)
    tm = max(128, (min(tm, n128) // 128) * 128)
    if n128 >= 2 * 128:
        tm = min(tm, _round_up(n128 // 2, 128))
    N_pad = _round_up(N, tm)
    G = N_pad // tm

    z_flat = z.reshape(N, D).astype(jnp.float32)
    if N_pad != N:
        z_flat = jnp.pad(z_flat, ((0, N_pad - N), (0, 0)))
    z_t = z_flat.T                                     # (D, N_pad) lane-dense

    # Hoist codebook normalization out of the grid (identical every step).
    e_norm = embedding.astype(jnp.float32)
    e_norm = e_norm / jnp.maximum(
        jnp.linalg.norm(e_norm, axis=-1, keepdims=True), 1e-12)
    e_sel = e_norm.astype(matmul_dtype)                # (n_embed, D)
    e_gat = e_norm.T                                   # (D, n_embed), f32

    kernel = functools.partial(
        _vq_kernel, tm=tm, n_valid=N, needs_mask=(N_pad != N),
        matmul_dtype=matmul_dtype)

    zq_t, idx_out, loss_rows = pl.pallas_call(
        kernel,
        out_shape=(
            jax.ShapeDtypeStruct((D, N_pad), jnp.float32),
            jax.ShapeDtypeStruct((1, N_pad), jnp.int32),
            jax.ShapeDtypeStruct((1, N_pad), jnp.float32),
        ),
        grid_spec=pltpu.PrefetchScalarGridSpec(
            num_scalar_prefetch=0,
            grid=(G,),
            in_specs=[
                pl.BlockSpec((D, tm), lambda i: (0, i)),          # token tile
                pl.BlockSpec((n_embed, D), lambda i: (0, 0)),     # codebook
                pl.BlockSpec((D, n_embed), lambda i: (0, 0)),     # codebook^T
            ],
            out_specs=[
                pl.BlockSpec((D, tm), lambda i: (0, i)),
                pl.BlockSpec((1, tm), lambda i: (0, i)),
                pl.BlockSpec((1, tm), lambda i: (0, i)),
            ],
        ),
        compiler_params=pltpu.CompilerParams(
            dimension_semantics=("parallel",)),
    )(z_t, e_sel, e_gat)

    loss = jnp.sum(loss_rows) * ((1.0 + beta) / (N * D))
    z_qnorm = zq_t[:, :N].T.reshape(B, S, D)
    indices = idx_out.reshape(N_pad)[:N].reshape(B, S)

    # straight_through: z_q = z + (z_q - z).detach()  (same forward value)
    z_out = z + jax.lax.stop_gradient(z_qnorm - z)
    return z_out, loss, indices


def _reference(z, embedding, beta=BETA):
    """Pure-JAX reference mirroring the torch VectorQuantizer forward."""
    B, S, D = z.shape
    zf = z.reshape(-1, D)
    zn = zf / jnp.maximum(jnp.linalg.norm(zf, axis=-1, keepdims=True), 1e-12)
    en = embedding / jnp.maximum(
        jnp.linalg.norm(embedding, axis=-1, keepdims=True), 1e-12)
    d = (jnp.sum(zn ** 2, 1, keepdims=True) + jnp.sum(en ** 2, 1)
         - 2.0 * zn @ en.T)
    idx = jnp.argmin(d, axis=1).astype(jnp.int32)
    zq = en[idx]
    loss = (1.0 + beta) * jnp.mean((zq - zn) ** 2)
    zq = zq.reshape(B, S, D)
    z_out = z + jax.lax.stop_gradient(zq - z)
    return z_out, loss, idx.reshape(B, S)


if __name__ == "__main__":
    key = jax.random.PRNGKey(0)
    kz, ke = jax.random.split(key)

    B, S, D = 2, 8, EMBED_DIM
    z = jax.random.normal(kz, (B, S, D), dtype=jnp.float32)
    # nn.Embedding weight init: uniform(-1/n_embed, 1/n_embed)
    embedding = jax.random.uniform(
        ke, (N_EMBED, EMBED_DIM), dtype=jnp.float32,
        minval=-1.0 / N_EMBED, maxval=1.0 / N_EMBED)

    z_q, loss, indices = base_quantizer_forward(z, embedding)
    jax.block_until_ready((z_q, loss, indices))

    zq_ref, loss_ref, idx_ref = _reference(z, embedding)
    assert jnp.allclose(z_q, zq_ref, atol=1e-5), "z_q mismatch"
    assert jnp.allclose(loss, loss_ref, rtol=1e-5, atol=1e-6), "loss mismatch"
    assert jnp.array_equal(indices, idx_ref), "indices mismatch"

    print("KERNEL_OK")
</pallas_src>

<mosaic_0001>
module attributes {stable_mosaic.version = 11 : i64} {
  func.func @_vq_kernel(%arg0: i32, %arg1: memref<32x128xf32, #tpu.memory_space<vmem>>, %arg2: memref<128x32xf32, #tpu.memory_space<vmem>>, %arg3: memref<32x128xf32, #tpu.memory_space<vmem>>, %arg4: memref<32x128xf32, #tpu.memory_space<vmem>>, %arg5: memref<1x128xi32, #tpu.memory_space<vmem>>, %arg6: memref<1x128xf32, #tpu.memory_space<vmem>>) attributes {dimension_semantics = [#tpu.dimension_semantics<parallel>], iteration_bounds = array<i64: 1>, scalar_prefetch = 0 : i64, scratch_operands = 0 : i64, tpu.core_type = #tpu.core_type<tc>, window_params = [{transform_indices = @transform_0, window_bounds = array<i64: 32, 128>}, {pipeline_mode = #tpu.pipeline_mode<synchronous>, transform_indices = @transform_1, window_bounds = array<i64: 128, 32>}, {pipeline_mode = #tpu.pipeline_mode<synchronous>, transform_indices = @transform_2, window_bounds = array<i64: 32, 128>}, {transform_indices = @transform_3, window_bounds = array<i64: 32, 128>}, {transform_indices = @transform_4, window_bounds = array<i64: 1, 128>}, {transform_indices = @transform_5, window_bounds = array<i64: 1, 128>}]} {
    %c0 = arith.constant 0 : index
    %c0_0 = arith.constant 0 : index
    %0 = vector.load %arg1[%c0, %c0_0] : memref<32x128xf32, #tpu.memory_space<vmem>>, vector<32x128xf32>
    %1 = arith.mulf %0, %0 : vector<32x128xf32>
    %cst = arith.constant dense<0.000000e+00> : vector<128xf32>
    %2 = vector.multi_reduction <add>, %1, %cst [0] : vector<32x128xf32> to vector<128xf32>
    %3 = vector.shape_cast %2 : vector<128xf32> to vector<1x128xf32>
    %cst_1 = arith.constant 1.000000e-24 : f32
    %4 = vector.broadcast %cst_1 : f32 to vector<1x128xf32>
    %5 = arith.maximumf %3, %4 : vector<1x128xf32>
    %6 = math.rsqrt %5 : vector<1x128xf32>
    %7 = vector.broadcast %6 : vector<1x128xf32> to vector<32x128xf32>
    %8 = arith.mulf %0, %7 : vector<32x128xf32>
    %c0_2 = arith.constant 0 : index
    %c0_3 = arith.constant 0 : index
    %9 = vector.load %arg2[%c0_2, %c0_3] : memref<128x32xf32, #tpu.memory_space<vmem>>, vector<128x32xf32>
    %cst_4 = arith.constant dense<0.000000e+00> : vector<128x128xf32>
    %10 = tpu.matmul %9, %8, %cst_4 {dimension_numbers = #tpu.dot_dimension_numbers<[1], [0], [0], [1], [0, 0, 1, 1], [], []>} : vector<128x32xf32>, vector<32x128xf32>, vector<128x128xf32> -> vector<128x128xf32>
    %cst_5 = arith.constant dense<0xFF800000> : vector<128xf32>
    %11 = vector.multi_reduction <maximumf>, %10, %cst_5 [0] : vector<128x128xf32> to vector<128xf32>
    %12 = vector.shape_cast %11 : vector<128xf32> to vector<1x128xf32>
    %13 = tpu.iota {dimensions = array<i32: 0>} : vector<128x128xi32>
    %14 = vector.broadcast %12 : vector<1x128xf32> to vector<128x128xf32>
    %15 = arith.cmpf oge, %10, %14 : vector<128x128xf32>
    %c128_i32 = arith.constant 128 : i32
    %16 = vector.broadcast %c128_i32 : i32 to vector<128x128xi32>
    %17 = arith.select %15, %13, %16 : vector<128x128xi1>, vector<128x128xi32>
    %cst_6 = arith.constant dense<2147483647> : vector<128xi32>
    %18 = vector.multi_reduction <minsi>, %17, %cst_6 [0] : vector<128x128xi32> to vector<128xi32>
    %19 = vector.shape_cast %18 : vector<128xi32> to vector<1x128xi32>
    %c0_7 = arith.constant 0 : index
    %c0_8 = arith.constant 0 : index
    %20 = vector.load %arg5[%c0_7, %c0_8] : memref<1x128xi32, #tpu.memory_space<vmem>>, vector<1x128xi32>
    tpu.vector_store %arg5[%c0_7, %c0_8], %19 {strides = array<i32>} : memref<1x128xi32, #tpu.memory_space<vmem>>, vector<1x128xi32>,
    %21 = vector.broadcast %19 : vector<1x128xi32> to vector<128x128xi32>
    %22 = arith.cmpi eq, %13, %21 : vector<128x128xi32>
    %23 = arith.extui %22 : vector<128x128xi1> to vector<128x128xi32>
    %24 = arith.sitofp %23 : vector<128x128xi32> to vector<128x128xf32>
    %c0_9 = arith.constant 0 : index
    %c0_10 = arith.constant 0 : index
    %25 = vector.load %arg3[%c0_9, %c0_10] : memref<32x128xf32, #tpu.memory_space<vmem>>, vector<32x128xf32>
    %cst_11 = arith.constant dense<0.000000e+00> : vector<32x128xf32>
    %26 = tpu.matmul %25, %24, %cst_11 {dimension_numbers = #tpu.dot_dimension_numbers<[1], [0], [0], [1], [0, 0, 1, 1], [], []>} : vector<32x128xf32>, vector<128x128xf32>, vector<32x128xf32> -> vector<32x128xf32>
    %c0_12 = arith.constant 0 : index
    %c0_13 = arith.constant 0 : index
    %27 = vector.load %arg4[%c0_12, %c0_13] : memref<32x128xf32, #tpu.memory_space<vmem>>, vector<32x128xf32>
    tpu.vector_store %arg4[%c0_12, %c0_13], %26 {strides = array<i32>} : memref<32x128xf32, #tpu.memory_space<vmem>>, vector<32x128xf32>,
    %28 = arith.subf %26, %8 : vector<32x128xf32>
    %29 = arith.mulf %28, %28 : vector<32x128xf32>
    %cst_14 = arith.constant dense<0.000000e+00> : vector<128xf32>
    %30 = vector.multi_reduction <add>, %29, %cst_14 [0] : vector<32x128xf32> to vector<128xf32>
    %31 = vector.shape_cast %30 : vector<128xf32> to vector<1x128xf32>
    %c128_i32_15 = arith.constant 128 : i32
    %32 = arith.muli %arg0, %c128_i32_15 : i32
    %33 = tpu.iota {dimensions = array<i32: 1>} : vector<1x128xi32>
    %34 = vector.broadcast %32 : i32 to vector<1x128xi32>
    %35 = arith.addi %34, %33 : vector<1x128xi32>
    %c16_i32 = arith.constant 16 : i32
    %36 = vector.broadcast %c16_i32 : i32 to vector<1x128xi32>
    %37 = arith.cmpi slt, %35, %36 : vector<1x128xi32>
    %cst_16 = arith.constant 0.000000e+00 : f32
    %38 = vector.broadcast %cst_16 : f32 to vector<1x128xf32>
    %39 = arith.select %37, %31, %38 : vector<1x128xi1>, vector<1x128xf32>
    %c0_17 = arith.constant 0 : index
    %c0_18 = arith.constant 0 : index
    %40 = vector.load %arg6[%c0_17, %c0_18] : memref<1x128xf32, #tpu.memory_space<vmem>>, vector<1x128xf32>
    tpu.vector_store %arg6[%c0_17, %c0_18], %39 {strides = array<i32>} : memref<1x128xf32, #tpu.memory_space<vmem>>, vector<1x128xf32>,
    return
  }
  func.func @transform_0(%arg0: i32) -> (i32, i32) {
    %c0_i32 = arith.constant 0 : i32
    %c0_i32_0 = arith.constant 0 : i32
    return %c0_i32, %arg0 : i32, i32
  }
  func.func @transform_1(%arg0: i32) -> (i32, i32) {
    %c0_i32 = arith.constant 0 : i32
    %c0_i32_0 = arith.constant 0 : i32
    %c0_i32_1 = arith.constant 0 : i32
    return %c0_i32, %c0_i32_0 : i32, i32
  }
  func.func @transform_2(%arg0: i32) -> (i32, i32) {
    %c0_i32 = arith.constant 0 : i32
    %c0_i32_0 = arith.constant 0 : i32
    %c0_i32_1 = arith.constant 0 : i32
    return %c0_i32, %c0_i32_0 : i32, i32
  }
  func.func @transform_3(%arg0: i32) -> (i32, i32) {
    %c0_i32 = arith.constant 0 : i32
    %c0_i32_0 = arith.constant 0 : i32
    return %c0_i32, %arg0 : i32, i32
  }
  func.func @transform_4(%arg0: i32) -> (i32, i32) {
    %c0_i32 = arith.constant 0 : i32
    %c0_i32_0 = arith.constant 0 : i32
    return %c0_i32, %arg0 : i32, i32
  }
  func.func @transform_5(%arg0: i32) -> (i32, i32) {
    %c0_i32 = arith.constant 0 : i32
    %c0_i32_0 = arith.constant 0 : i32
    return %c0_i32, %arg0 : i32, i32
  }
}

</mosaic_0001>

<bundles_post_ra>
// kernel: tpu_custom_call.1
= control target key start
LH: loop header
LB: loop body
LE: loop exit
PB: predicated region body
PF: predicated region fallthrough
CT: control target
= control target key end

     0   :  { %11 = vsyncpa [#allocation3], 0  ;;  %vm58_vm0 = vcmask 261120   ;;  %s1152_s0 = inlined_call_operand.vmem [shape: f32[32,128], index: 0, kind: input, shape index: {}]   ;;  %s1153_s1 = inlined_call_operand.vmem [shape: f32[128,32], index: 1, kind: input, shape index: {}]   ;;  %s1154_s2 = inlined_call_operand.vmem [shape: f32[32,128], index: 2, kind: input, shape index: {}]   ;;  %s1155_s3 = inlined_call_operand.hbm [shape: f32[32,128], index: 3, kind: output, shape index: {0}]   ;;  %s1156_s4 = inlined_call_operand.hbm [shape: s32[1,128], index: 4, kind: output, shape index: {1}]   ;;  %s1157_s5 = inlined_call_operand.hbm [shape: f32[1,128], index: 5, kind: output, shape index: {2}]  }
   0x1   :  { %v19_v0 = vld [vmem:[%s1152_s0] sm:$0xff]  ;;  %v20_v1 = vld [vmem:[%s1152_s0 + $0x8] sm:$0xff]  ;;  %v21_v2 = vld [vmem:[%s1152_s0 + $0x10] sm:$0xff] }
   0x2   :  { %v22_v3 = vld [vmem:[%s1152_s0 + $0x18] sm:$0xff]  ;;  %v23_v4 = vmul.f32 %v19_v0, %v19_v0  ;;  %v24_v5 = vmul.f32 %v20_v1, %v20_v1  ;;  %v25_v6 = vmul.f32 %v21_v2, %v21_v2  ;;  %v42_v7 = vld [vmem:[%s1153_s1] sm:$0xff] }
   0x3   :  { %667 = vmatprep.mubr.msk.f32.mxu0 %vm58_vm0, %v42_v7  ;;  %v26_v8 = vmul.f32 %v22_v3, %v22_v3 }
   0x4   :  { %v27_v9 = vadd.f32 %v24_v5, %v23_v4 }
   0x6   :  { %v28_v10 = vadd.f32 %v27_v9, %v25_v6 }
   0x7   :  { %12 = vsyncpa [#allocation5], 0  ;;  %v43_v26 = vld [vmem:[%s1153_s1 + $0x8] sm:$0xff]  ;;  %v44_v27 = vld [vmem:[%s1153_s1 + $0x10] sm:$0xff]  ;;  %s848_s13 = smov [#allocation4]  }
   0x8   :  { %v29_v11 = vadd.f32 %v28_v10, %v26_v8  ;;  %v45_v28 = vld [vmem:[%s1153_s1 + $0x18] sm:$0xff]  ;;  %v46_v29 = vld [vmem:[%s1153_s1 + $0x20] sm:$0xff]  ;;  %v47_v30 = vld [vmem:[%s1153_s1 + $0x28] sm:$0xff]  ;;  %v273_v10 = vlaneseq  ;;  %s546_s14 = sshll.u32 %s848_s13, 4  ;;  %s547_s14 = int_to_ptr.vmem [resolvable:$true] %s546_s14 }
   0x9   :  { %v48_v31 = vld [vmem:[%s1153_s1 + $0x30] sm:$0xff]  ;;  %v49_v32 = vld [vmem:[%s1153_s1 + $0x38] sm:$0xff]  ;;  %v50_v33 = vld [vmem:[%s1153_s1 + $0x40] sm:$0xff]  ;;  %s777_s15 = scalar_lea.vmem %s547_s14, 16  ;;  %s781_s16 = scalar_lea.vmem %s547_s14, 32 }
   0xa   :  { %v30_v12 = vrot.slane %v29_v11, 4  ;;  %v51_v34 = vld [vmem:[%s1153_s1 + $0x48] sm:$0xff]  ;;  %v52_v35 = vld [vmem:[%s1153_s1 + $0x50] sm:$0xff]  ;;  %v53_v36 = vld [vmem:[%s1153_s1 + $0x58] sm:$0xff]  ;;  %p778_p0 = scmp.ne.s32.totalorder %s547_s14, %s777_s15  ;;  %p782_p1 = scmp.lt.s32.totalorder %s547_s14, %s547_s14 }
   0xb   :  { %v54_v37 = vld [vmem:[%s1153_s1 + $0x60] sm:$0xff]  ;;  %v55_v38 = vld [vmem:[%s1153_s1 + $0x68] sm:$0xff]  ;;  %v56_v39 = vld [vmem:[%s1153_s1 + $0x70] sm:$0xff]  ;;  %p783_p2 = scmp.lt.s32.totalorder %s781_s16, %s777_s15 }
   0xc   :  { %v31_v13 = vadd.f32 %v30_v12, %v29_v11  ;;  %v57_v40 = vld [vmem:[%s1153_s1 + $0x78] sm:$0xff]  ;;  %v410_v41 = vld [vmem:[%s1154_s2] sm:$0xff] }
   0xd   :  { %723 = vmatprep.mubr.f32.mxu1 %v410_v41  ;;  %p784_p3 = por %p783_p2, %p782_p1 }
   0xe   :  { %v32_v14 = vrot.slane %v31_v13, 2 }
   0xf   :  { %p785_p4 = pnand %p784_p3, %p778_p0 }
  0x10   :  { %v33_v15 = vadd.f32 %v32_v14, %v31_v13  ;;  %v999_v13 = vshrl.u32 %v273_v10, 7 }
  0x12   :  { %v34_v16 = vrot.slane %v33_v15, 1 }
  0x14   :  { %v35_v17 = vadd.f32 %v34_v16, %v33_v15  ;;  %v1002_v16 = vadd.s32 16, %v999_v13 }
  0x16   :  { %v36_v18 = vmax.f32 %v35_v17, 1e-24  ;;  %v1005_v17 = vadd.s32 24, %v999_v13 }
  0x18   :  { %775 = vrsqrt.f32 %v36_v18  ;;  %v1008_v18 = vadd.s32 48, %v999_v13 }
  0x22   :  { %v776_v19 = vpop.eup %775 }
  0x23   :  { %v899_v20 = vmul.f32 %v776_v19, %v19_v0  ;;  %v901_v21 = vmul.f32 %v776_v19, %v20_v1  ;;  %v903_v22 = vmul.f32 %v776_v19, %v21_v2  ;;  %v905_v23 = vmul.f32 %v776_v19, %v22_v3 }
  0x24   :  { %v1011_v19 = vadd.s32 56, %v999_v13 }
  0x25   :  { %v729_v24 = vpack.c.bf16 %v901_v21, %v899_v20  ;;  %v733_v25 = vpack.c.bf16 %v905_v23, %v903_v22 }
  0x27   :  { %730 = vmatprep.subr.bf16.mxu0 %v729_v24 }
  0x28   :  { %732 = vmatpush3.bf16.msra.mxu0 %v729_v24  ;;  %v1014_v24 = vadd.s32 80, %v999_v13 }
  0x29   :  { %734 = vmatprep.subr.bf16.mxu0 %v733_v25 }
  0x2c   :  { %736 = vmatpush3.bf16.msra.mxu0 %v733_v25  ;;  %v1017_v25 = vadd.s32 88, %v999_v13 }
  0x2f   :  { %668 = vmatmul.mubr.msk.f32.vlgmr.msra.gmra.mrb[0].mxu0 %vm58_vm0, %v43_v26 }
  0x30   :  { %670 = vmatprep.mubr.msk.f32.mxu0 %vm58_vm0, %v44_v27  ;;  %v1020_v27 = vadd.s32 112, %v999_v13 }
  0x33   :  { %671 = vmatmul.mubr.msk.f32.gmra.mrb[2].mxu0 %vm58_vm0, %v45_v28  ;;  %v1023_v28 = vadd.s32 120, %v999_v13 }
  0x34   :  { %673 = vmatprep.mubr.msk.f32.mxu0 %vm58_vm0, %v46_v29  ;;  %v1026_v29 = vadd.s32 8, %v999_v13 }
  0x37   :  { %674 = vmatmul.mubr.msk.f32.gmra.mrb[4].mxu0 %vm58_vm0, %v47_v30  ;;  %v1029_v30 = vadd.s32 32, %v999_v13 }
  0x38   :  { %676 = vmatprep.mubr.msk.f32.mxu0 %vm58_vm0, %v48_v31  ;;  %v1032_v31 = vadd.s32 40, %v999_v13 }
  0x3b   :  { %677 = vmatmul.mubr.msk.f32.gmra.mrb[6].mxu0 %vm58_vm0, %v49_v32  ;;  %v1035_v32 = vadd.s32 64, %v999_v13 }
  0x3c   :  { %679 = vmatprep.mubr.msk.f32.mxu0 %vm58_vm0, %v50_v33  ;;  %v1038_v33 = vadd.s32 72, %v999_v13 }
  0x3f   :  { %680 = vmatmul.mubr.msk.f32.gmra.mrb[8].mxu0 %vm58_vm0, %v51_v34 }
  0x40   :  { %682 = vmatprep.mubr.msk.f32.mxu0 %vm58_vm0, %v52_v35 }
  0x43   :  { %683 = vmatmul.mubr.msk.f32.gmra.mrb[10].mxu0 %vm58_vm0, %v53_v36 }
  0x44   :  { %685 = vmatprep.mubr.msk.f32.mxu0 %vm58_vm0, %v54_v37 }
  0x47   :  { %686 = vmatmul.mubr.msk.f32.gmra.mrb[12].mxu0 %vm58_vm0, %v55_v38 }
  0x48   :  { %688 = vmatprep.mubr.msk.f32.mxu0 %vm58_vm0, %v56_v39 }
  0x4b   :  { %689 = vmatmul.mubr.msk.f32.gmra.mrb[14].mxu0 %vm58_vm0, %v57_v40 }
 0x102   :  { %v974_v42 = vpop.f32.mrb[0].mxu0 }
 0x103   :  { %v976_v43 = vpop.f32.mrb[1].mxu0 }
 0x106   :  { %v672_v44 = vpop.f32.mrb[2].mxu0 }
 0x107   :  { %v183_v45 = vpop.f32.mrb[3].mxu0 }
 0x10a   :  { %v978_v46 = vpop.f32.mrb[4].mxu0 }
 0x10b   :  { %v253_v47 = vmax.f32 %v974_v42, %v978_v46  ;;  %v982_v48 = vpop.f32.mrb[5].mxu0 }
 0x10c   :  { %v252_v49 = vmax.f32 %v976_v43, %v982_v48 }
 0x10e   :  { %v678_v50 = vpop.f32.mrb[6].mxu0 }
 0x10f   :  { %v255_v51 = vmax.f32 %v672_v44, %v678_v50  ;;  %v203_v52 = vpop.f32.mrb[7].mxu0 }
 0x110   :  { %v254_v53 = vmax.f32 %v183_v45, %v203_v52 }
 0x112   :  { %v986_v54 = vpop.f32.mrb[8].mxu0 }
 0x113   :  { %v257_v55 = vmax.f32 %v253_v47, %v986_v54  ;;  %v989_v56 = vpop.f32.mrb[9].mxu0 }
 0x114   :  { %v256_v57 = vmax.f32 %v252_v49, %v989_v56 }
 0x116   :  { %v684_v58 = vpop.f32.mrb[10].mxu0 }
 0x117   :  { %v259_v59 = vmax.f32 %v255_v51, %v684_v58  ;;  %v223_v60 = vpop.f32.mrb[11].mxu0 }
 0x118   :  { %v258_v61 = vmax.f32 %v254_v53, %v223_v60 }
 0x11a   :  { %v992_v62 = vpop.f32.mrb[12].mxu0 }
 0x11b   :  { %v261_v63 = vmax.f32 %v257_v55, %v992_v62  ;;  %v995_v0 = vpop.f32.mrb[13].mxu0 }
 0x11c   :  { %v260_v1 = vmax.f32 %v256_v57, %v995_v0 }
 0x11e   :  { %v264_v2 = vmax.f32 %v260_v1, %v261_v63  ;;  %v690_v3 = vpop.f32.mrb[14].mxu0 }
 0x11f   :  { %v263_v4 = vmax.f32 %v259_v59, %v690_v3  ;;  %v243_v5 = vpop.f32.mrb[15].mxu0 }
 0x120   :  { %v262_v6 = vmax.f32 %v258_v61, %v243_v5 }
 0x122   :  { %v265_v7 = vmax.f32 %v262_v6, %v263_v4 }
 0x124   :  { %v266_v8 = vmax.f32 %v264_v2, %v265_v7 }
 0x126   :  { %v267_v9 = vrot.slane %v266_v8, 4 }
 0x128   :  { %v268_v11 = vmax.f32 %v266_v8, %v267_v9  ;;  %v847_v9 = vmov 1.0|1.0  }
 0x12a   :  { %v269_v12 = vrot.slane %v268_v11, 2 }
 0x12c   :  { %v270_v14 = vmax.f32 %v268_v11, %v269_v12  ;;  %v411_v11 = vld [vmem:[%s1154_s2 + $0x8] sm:$0xff]  ;;  %v412_v12 = vld [vmem:[%s1154_s2 + $0x10] sm:$0xff] }
 0x12e   :  { %v271_v15 = vrot.slane %v270_v14, 1 }
 0x130   :  { %v272_v26 = vmax.f32 %v270_v14, %v271_v15 }
 0x132   :  { %vm292_vm1 = vcmp.ge.f32.partialorder %v183_v45, %v272_v26  ;;  %vm293_vm2 = vcmp.ge.f32.partialorder %v672_v44, %v272_v26  ;;  %vm296_vm3 = vcmp.ge.f32.partialorder %v203_v52, %v272_v26  ;;  %vm297_vm4 = vcmp.ge.f32.partialorder %v678_v50, %v272_v26 }
 0x133   :  { %vm300_vm5 = vcmp.ge.f32.partialorder %v223_v60, %v272_v26  ;;  %vm301_vm6 = vcmp.ge.f32.partialorder %v684_v58, %v272_v26  ;;  %vm304_vm7 = vcmp.ge.f32.partialorder %v243_v5, %v272_v26  ;;  %vm305_vm8 = vcmp.ge.f32.partialorder %v690_v3, %v272_v26 }
 0x134   :  { %v308_v34 = vsel %vm292_vm1, %v1002_v16, 128  ;;  %v309_v35 = vsel %vm293_vm2, %v1005_v17, 128  ;;  %v312_v36 = vsel %vm296_vm3, %v1008_v18, 128  ;;  %v313_v37 = vsel %vm297_vm4, %v1011_v19, 128 }
 0x135   :  { %v316_v38 = vsel %vm300_vm5, %v1014_v24, 128  ;;  %v317_v39 = vsel %vm301_vm6, %v1017_v25, 128  ;;  %v320_v40 = vsel %vm304_vm7, %v1020_v27, 128  ;;  %v321_v41 = vsel %vm305_vm8, %v1023_v28, 128 }
 0x136   :  { %vm326_vm9 = vcmp.lt.s32.totalorder %v308_v34, %v312_v36  ;;  %vm328_vm10 = vcmp.lt.s32.totalorder %v309_v35, %v313_v37  ;;  %vm290_vm11 = vcmp.ge.f32.partialorder %v976_v43, %v272_v26  ;;  %vm291_vm12 = vcmp.ge.f32.partialorder %v974_v42, %v272_v26 }
 0x137   :  { %v327_v44 = vsel %vm326_vm9, %v308_v34, %v312_v36  ;;  %v329_v45 = vsel %vm328_vm10, %v309_v35, %v313_v37  ;;  %vm294_vm13 = vcmp.ge.f32.partialorder %v982_v48, %v272_v26  ;;  %vm295_vm14 = vcmp.ge.f32.partialorder %v978_v46, %v272_v26 }
 0x138   :  { %vm334_vm15 = vcmp.lt.s32.totalorder %v327_v44, %v316_v38  ;;  %vm336_vm0 = vcmp.lt.s32.totalorder %v329_v45, %v317_v39  ;;  %vm298_vm1 = vcmp.ge.f32.partialorder %v989_v56, %v272_v26  ;;  %vm299_vm2 = vcmp.ge.f32.partialorder %v986_v54, %v272_v26 }
 0x139   :  { %v335_v47 = vsel %vm334_vm15, %v327_v44, %v316_v38  ;;  %v337_v49 = vsel %vm336_vm0, %v329_v45, %v317_v39  ;;  %vm302_vm3 = vcmp.ge.f32.partialorder %v995_v0, %v272_v26  ;;  %vm303_vm4 = vcmp.ge.f32.partialorder %v992_v62, %v272_v26 }
 0x13a   :  { %vm342_vm5 = vcmp.lt.s32.totalorder %v335_v47, %v320_v40  ;;  %vm344_vm6 = vcmp.lt.s32.totalorder %v337_v49, %v321_v41  ;;  %v306_v50 = vsel %vm290_vm11, %v999_v13, 128  ;;  %v307_v51 = vsel %vm291_vm12, %v1026_v29, 128 }
 0x13b   :  { %v343_v52 = vsel %vm342_vm5, %v335_v47, %v320_v40  ;;  %v345_v53 = vsel %vm344_vm6, %v337_v49, %v321_v41  ;;  %v310_v55 = vsel %vm294_vm13, %v1029_v30, 128  ;;  %v311_v57 = vsel %vm295_vm14, %v1032_v31, 128 }
 0x13c   :  { %vm348_vm7 = vcmp.lt.s32.totalorder %v343_v52, %v345_v53  ;;  %v1069_v58 = vadd.s32 96, %v999_v13  ;;  %v1072_v43 = vadd.s32 104, %v999_v13  ;;  %vm322_vm8 = vcmp.lt.s32.totalorder %v306_v50, %v310_v55 }
 0x13d   :  { %v349_v59 = vsel %vm348_vm7, %v343_v52, %v345_v53  ;;  %vm324_vm9 = vcmp.lt.s32.totalorder %v307_v51, %v311_v57  ;;  %v314_v42 = vsel %vm298_vm1, %v1035_v32, 128  ;;  %v315_v48 = vsel %vm299_vm2, %v1038_v33, 128 }
 0x13e   :  { %v323_v46 = vsel %vm322_vm8, %v306_v50, %v310_v55  ;;  %v325_v60 = vsel %vm324_vm9, %v307_v51, %v311_v57  ;;  %v318_v61 = vsel %vm302_vm3, %v1069_v58, 128  ;;  %v319_v63 = vsel %vm303_vm4, %v1072_v43, 128 }
 0x13f   :  { %vm330_vm10 = vcmp.lt.s32.totalorder %v323_v46, %v314_v42  ;;  %vm332_vm11 = vcmp.lt.s32.totalorder %v325_v60, %v315_v48 }
 0x140   :  { %v331_v1 = vsel %vm330_vm10, %v323_v46, %v314_v42  ;;  %v333_v2 = vsel %vm332_vm11, %v325_v60, %v315_v48 }
 0x141   :  { %vm338_vm12 = vcmp.lt.s32.totalorder %v331_v1, %v318_v61  ;;  %vm340_vm13 = vcmp.lt.s32.totalorder %v333_v2, %v319_v63 }
 0x142   :  { %v339_v56 = vsel %vm338_vm12, %v331_v1, %v318_v61  ;;  %v341_v3 = vsel %vm340_vm13, %v333_v2, %v319_v63 }
 0x143   :  { %vm346_vm14 = vcmp.lt.s32.totalorder %v339_v56, %v341_v3 }
 0x144   :  { %v347_v54 = vsel %vm346_vm14, %v339_v56, %v341_v3 }
 0x145   :  { %vm350_vm15 = vcmp.lt.s32.totalorder %v347_v54, %v349_v59 }
 0x146   :  { %v351_v4 = vsel %vm350_vm15, %v347_v54, %v349_v59 }
 0x147   :  { %v352_v5 = vrot.slane %v351_v4, 4 }
 0x149   :  { %vm353_vm0 = vcmp.lt.s32.totalorder %v351_v4, %v352_v5 }
 0x14a   :  { %v354_v6 = vsel %vm353_vm0, %v351_v4, %v352_v5 }
 0x14b   :  { %v355_v7 = vrot.slane %v354_v6, 2 }
 0x14d   :  { %vm356_vm1 = vcmp.lt.s32.totalorder %v354_v6, %v355_v7 }
 0x14e   :  { %v357_v0 = vsel %vm356_vm1, %v354_v6, %v355_v7 }
 0x14f   :  { %v358_v8 = vrot.slane %v357_v0, 1 }
 0x151   :  { %vm359_vm2 = vcmp.lt.s32.totalorder %v357_v0, %v358_v8 }
 0x152   :  { %v360_v62 = vsel %vm359_vm2, %v357_v0, %v358_v8 }
 0x153   :  { %vm362_vm3 = vcmp.eq.s32.totalorder %v999_v13, %v360_v62  ;;  %vm363_vm4 = vcmp.eq.s32.totalorder %v1026_v29, %v360_v62  ;;  %361 = vst [vmem:[#allocation4] sm:$0x1] %v360_v62  ;;  %vm364_vm5 = vcmp.eq.s32.totalorder %v1002_v16, %v360_v62  ;;  %vm365_vm6 = vcmp.eq.s32.totalorder %v1005_v17, %v360_v62  ;;  %v413_v13 = vld [vmem:[%s1154_s2 + $0x18] sm:$0xff] }
 0x154   :  { %vm737_vm7 = vmpackc.low %vm363_vm4, %vm362_vm3  ;;  %vm366_vm9 = vcmp.eq.s32.totalorder %v1029_v30, %v360_v62  ;;  %vm367_vm10 = vcmp.eq.s32.totalorder %v1032_v31, %v360_v62  ;;  %vm368_vm12 = vcmp.eq.s32.totalorder %v1008_v18, %v360_v62  ;;  %vm369_vm13 = vcmp.eq.s32.totalorder %v1011_v19, %v360_v62 }
 0x155   :  { %738 = vmatprep.subr.msk.bf16.mxu1 %vm737_vm7, %v847_v9  ;;  %vm741_vm8 = vmpackc.low %vm365_vm6, %vm364_vm5  ;;  %vm370_vm15 = vcmp.eq.s32.totalorder %v1035_v32, %v360_v62  ;;  %vm371_vm0 = vcmp.eq.s32.totalorder %v1038_v33, %v360_v62  ;;  %vm372_vm2 = vcmp.eq.s32.totalorder %v1014_v24, %v360_v62  ;;  %vm373_vm3 = vcmp.eq.s32.totalorder %v1017_v25, %v360_v62 }
 0x156   :  { %740 = vmatpush3.bf16.msk.msra.mxu1 %vm737_vm7, %v847_v9  ;;  %vm745_vm11 = vmpackc.low %vm367_vm10, %vm366_vm9  ;;  %vm374_vm5 = vcmp.eq.s32.totalorder %v1069_v58, %v360_v62  ;;  %vm375_vm6 = vcmp.eq.s32.totalorder %v1072_v43, %v360_v62  ;;  %vm377_vm9 = vcmp.eq.s32.totalorder %v1023_v28, %v360_v62 }
 0x157   :  { %742 = vmatprep.subr.msk.bf16.mxu1 %vm741_vm8, %v847_v9  ;;  %vm749_vm14 = vmpackc.low %vm369_vm13, %vm368_vm12 }
 0x158   :  { %vm753_vm1 = vmpackc.low %vm371_vm0, %vm370_vm15 }
 0x159   :  { %vm757_vm4 = vmpackc.low %vm373_vm3, %vm372_vm2 }
 0x15a   :  { %744 = vmatpush3.bf16.msk.msra.mxu1 %vm741_vm8, %v847_v9  ;;  %vm761_vm7 = vmpackc.low %vm375_vm6, %vm374_vm5  ;;  %vm376_vm8 = vcmp.eq.s32.totalorder %v1020_v27, %v360_v62 }
 0x15b   :  { %746 = vmatprep.subr.msk.bf16.mxu1 %vm745_vm11, %v847_v9  ;;  %vm765_vm10 = vmpackc.low %vm377_vm9, %vm376_vm8 }
 0x15e   :  { %748 = vmatpush3.bf16.msk.msra.mxu1 %vm745_vm11, %v847_v9 }
 0x15f   :  { %750 = vmatprep.subr.msk.bf16.mxu1 %vm749_vm14, %v847_v9 }
 0x162   :  { %752 = vmatpush3.bf16.msk.msra.mxu1 %vm749_vm14, %v847_v9 }
 0x163   :  { %754 = vmatprep.subr.msk.bf16.mxu1 %vm753_vm1, %v847_v9 }
 0x166   :  { %756 = vmatpush3.bf16.msk.msra.mxu1 %vm753_vm1, %v847_v9 }
 0x167   :  { %758 = vmatprep.subr.msk.bf16.mxu1 %vm757_vm4, %v847_v9 }
 0x16a   :  { %760 = vmatpush3.bf16.msk.msra.mxu1 %vm757_vm4, %v847_v9 }
 0x16b   :  { %762 = vmatprep.subr.msk.bf16.mxu1 %vm761_vm7, %v847_v9 }
 0x16e   :  { %764 = vmatpush3.bf16.msk.msra.mxu1 %vm761_vm7, %v847_v9 }
 0x16f   :  { %766 = vmatprep.subr.msk.bf16.mxu1 %vm765_vm10, %v847_v9 }
 0x172   :  { %768 = vmatpush3.bf16.msk.msra.mxu1 %vm765_vm10, %v847_v9 }
 0x175   :  { %724 = vmatmul.mubr.f32.vlgmr.msra.gmra.mrb[0].mxu1 %v411_v11 }
 0x176   :  { %726 = vmatprep.mubr.f32.mxu1 %v412_v12 }
 0x179   :  { %727 = vmatmul.mubr.f32.gmra.mrb[2].mxu1 %v413_v13 }
 0x17a   :  { %788 = shalt.err (!%p785_p4)
}
 0x17b   :  { %s789_s19 = scalar_lea.hbm %s1156_s4, 16 }
 0x17c   :  { %p790_p5 = scmp.ne.s32.totalorder %s1156_s4, %s789_s19  ;;  %p793_p6 = scmp.lt.u32.totalorder %s789_s19, %s1156_s4 }
 0x17e   :  { %p795_p7 = pnand %p793_p6, %p790_p5 }
 0x180   :  { %798 = shalt.err (!%p795_p7)
}
 0x181   :  { %549 = dma.vmem_to_hbm [thread:$0]  %s547_s14, 16, %s1156_s4, [#allocation5]  }
 0x182   :  { %s849_s25 = smov [#allocation2]  }
 0x183   :  { %s533_s26 = sshll.u32 %s849_s25, 4  ;;  %s534_s26 = int_to_ptr.vmem [resolvable:$true] %s533_s26 }
 0x184   :  { %s799_s4 = scalar_lea.vmem %s534_s26, 512  ;;  %p804_p9 = scmp.lt.s32.totalorder %s534_s26, %s534_s26 }
 0x185   :  { %p800_p8 = scmp.ne.s32.totalorder %s534_s26, %s799_s4  ;;  %p805_p10 = scmp.lt.s32.totalorder %s799_s4, %s799_s4 }
 0x187   :  { %p806_p11 = por %p805_p10, %p804_p9 }
 0x189   :  { %p807_p12 = pnand %p806_p11, %p800_p8 }
 0x248   :  { %v725_v14 = vpop.f32.mrb[0].mxu1 }
 0x249   :  { %500 = vst [vmem:[#allocation2 + $0x8] sm:$0xff] %v725_v14  ;;  %v504_v15 = vsub.f32 %v725_v14, %v901_v21  ;;  %v480_v16 = vpop.f32.mrb[1].mxu1 }
 0x24a   :  { %499 = vst [vmem:[#allocation2] sm:$0xff] %v480_v16  ;;  %v503_v17 = vsub.f32 %v480_v16, %v899_v20 }
 0x24b   :  { %v508_v18 = vmul.f32 %v504_v15, %v504_v15 }
 0x24c   :  { %v507_v19 = vmul.f32 %v503_v17, %v503_v17  ;;  %v728_v24 = vpop.f32.mrb[2].mxu1 }
 0x24d   :  { %502 = vst [vmem:[#allocation2 + $0x18] sm:$0xff] %v728_v24  ;;  %v490_v25 = vpop.f32.mrb[3].mxu1  ;;  %v506_v27 = vsub.f32 %v728_v24, %v905_v23 }
 0x24e   :  { %v511_v26 = vadd.f32 %v508_v18, %v507_v19  ;;  %501 = vst [vmem:[#allocation2 + $0x10] sm:$0xff] %v490_v25  ;;  %v505_v28 = vsub.f32 %v490_v25, %v903_v22 }
 0x24f   :  { %810 = shalt.err (!%p807_p12)
}
 0x250   :  { %s811_s28 = scalar_lea.hbm %s1155_s3, 512 }
 0x251   :  { %p812_p13 = scmp.ne.s32.totalorder %s1155_s3, %s811_s28  ;;  %p815_p0 = scmp.lt.u32.totalorder %s811_s28, %s1155_s3 }
 0x253   :  { %p817_p1 = pnand %p815_p0, %p812_p13 }
 0x255   :  { %820 = shalt.err (!%p817_p1)
}
 0x256   :  { %s850_s1 = smov 128   ;;  %s851_s8 = smov 8   ;;  %v509_v20 = vmul.f32 %v505_v28, %v505_v28  ;;  %v510_v21 = vmul.f32 %v506_v27, %v506_v27  ;;  %v522_v32 = vand.u32 127, %v273_v10 }
 0x257   :  { %539 = dma.vmem_to_hbm [thread:$0]  %s534_s26, 512, %s1155_s3, [#allocation3], %s850_s1, %s850_s1, %s851_s8  }
 0x258   :  { %v512_v22 = vadd.f32 %v511_v26, %v509_v20  ;;  %s852_s11 = smov [#allocation6]   ;;  %vm525_vm11 = vcmp.lt.s32.totalorder %v522_v32, 16 }
 0x259   :  { %s556_s12 = sshll.u32 %s852_s11, 4  ;;  %s557_s12 = int_to_ptr.vmem [resolvable:$true] %s556_s12 }
 0x25a   :  { %v513_v23 = vadd.f32 %v512_v22, %v510_v21  ;;  %s821_s13 = scalar_lea.vmem %s557_s12, 16  ;;  %s825_s3 = scalar_lea.vmem %s557_s12, 32 }
 0x25b   :  { %p822_p2 = scmp.ne.s32.totalorder %s557_s12, %s821_s13  ;;  %p826_p3 = scmp.lt.s32.totalorder %s557_s12, %s557_s12 }
 0x25c   :  { %v514_v29 = vrot.slane %v513_v23, 4  ;;  %p827_p4 = scmp.lt.s32.totalorder %s825_s3, %s821_s13 }
 0x25e   :  { %v515_v30 = vadd.f32 %v514_v29, %v513_v23  ;;  %p828_p5 = por %p827_p4, %p826_p3 }
 0x260   :  { %v516_v31 = vrot.slane %v515_v30, 2  ;;  %p829_p6 = pnand %p828_p5, %p822_p2 }
 0x262   :  { %v517_v33 = vadd.f32 %v516_v31, %v515_v30 }
 0x264   :  { %v518_v34 = vrot.slane %v517_v33, 1 }
 0x266   :  { %v519_v35 = vadd.f32 %v518_v34, %v517_v33 }
 0x268   :  { %v526_v36 = vsel %vm525_vm11, %v519_v35, 0.0 }
 0x269   :  { %527 = vst [vmem:[#allocation6] sm:$0x1] %v526_v36 }
 0x26a   :  { %832 = shalt.err (!%p829_p6)
}
 0x26b   :  { %s833_s16 = scalar_lea.hbm %s1157_s5, 16 }
 0x26c   :  { %p834_p7 = scmp.ne.s32.totalorder %s1157_s5, %s833_s16  ;;  %p837_p8 = scmp.lt.u32.totalorder %s833_s16, %s1157_s5 }
 0x26e   :  { %p839_p9 = pnand %p837_p8, %p834_p7 }
 0x270   :  { %842 = shalt.err (!%p839_p9)
}
 0x271   :  { %559 = dma.vmem_to_hbm [thread:$0]  %s557_s12, 16, %s1157_s5, [#allocation5]  }
 0x272   :  { %843 = dma.done.wait [#allocation3], 512  }
 0x273   :  { %844 = vsyncadd [#allocation3], 4294966784 }
 0x274   :  { %845 = dma.done.wait [#allocation5], 32  }
 0x275   :  { %846 = vsyncadd [#allocation5], 4294967264 }
 0x276   :  { %569 = vsyncpa [#allocation3], 1 }
 0x277   :  { %570 = vsyncpa [#allocation5], 1 }

</bundles_post_ra>
